<compile_context>
chip_gen: v6e
topology: v6e:2x2x1
jax: 0.10.0
libtpu: 0.0.40
codegen_flags: <defaults>
</compile_context>

<pallas_src>
import jax
import jax.numpy as jnp
from jax.experimental import pallas as pl
from jax.experimental.pallas import tpu as pltpu


def _round_up(x, m):
    return ((x + m - 1) // m) * m


def _cdiv(a, b):
    return (a + b - 1) // b


def _resident_spec(shape):
    """BlockSpec for a grid-invariant operand: single VMEM buffer if supported."""
    index_map = lambda i: (0,) * len(shape)
    try:
        return pl.BlockSpec(shape, index_map, pipeline_mode=pl.Buffered(1))
    except (TypeError, AttributeError):
        # Older jax without pipeline_mode: fall back to default double-buffering.
        return pl.BlockSpec(shape, index_map)


def spectral_adapter_kernel(x_ref, w_ref, bias_ref, o_ref):
    # x_ref:    (TN, D) tile of input rows
    # w_ref:    (D, D)  fused weight  W = (basis * lambdas[:,None]) @ basis.T
    # bias_ref: (1, D)  mean @ W   (f32)
    y = jnp.dot(x_ref[...], w_ref[...], preferred_element_type=jnp.float32)
    o_ref[...] = (y - bias_ref[...]).astype(o_ref.dtype)


def spectral_adapter_forward(x, mean, basis, lambdas, *,
                             tile_n=1024, compute_dtype=None):
    N, D = x.shape
    assert basis.shape == (D, D), "this kernel implements the square-basis case"
    # TODO(synk): rectangular basis needs inverse_basis = inv(basis@basis.T)@basis
    # precomputed in the wrapper plus a K-tiled reduction grid for very large D.
    # TODO(synk): if D is not a multiple of 128, pad the feature dim to 128 in the
    # wrapper for lane-dense (unmasked) stores; block last dim == full D stays correct.

    # ---- one-time precompute, hoisted out of the kernel (grid-invariant) ----
    w = (basis * lambdas[:, None]) @ basis.T            # (D, D) fused weight, f32
    if compute_dtype is not None:                       # e.g. jnp.bfloat16 on v6e/v7x
        w = w.astype(compute_dtype)
        x = x.astype(compute_dtype)                     # halves x/out HBM traffic
    # bias from the SAME (possibly cast) W so the mean term cancels exactly.
    bias = mean.reshape(1, D).astype(jnp.float32) @ w.astype(jnp.float32)  # (1, D) f32

    out_dtype = x.dtype
    x_item = jnp.dtype(x.dtype).itemsize
    o_item = jnp.dtype(out_dtype).itemsize
    w_item = jnp.dtype(w.dtype).itemsize
    # dtype-aware minimum sublane tile: f32 -> 8, bf16 -> 16, int8/fp8 -> 32.
    sublane_mult = max(8, 32 // min(x_item, o_item))

    # ---- generation-aware VMEM budget ----
    try:
        vmem_cap = int(pltpu.get_tpu_info().vmem_capacity_bytes)
    except Exception:
        vmem_cap = 64 * 2**20                           # conservative (v7x per-TC)

    resident = D * D * w_item + D * 4                   # W + bias, single-buffered
    per_row = 2 * D * (x_item + o_item)                 # x/out tiles, double-buffered
    budget = max(int(0.75 * vmem_cap) - resident, sublane_mult * per_row)
    tile_from_vmem = max(sublane_mult, (budget // per_row) // sublane_mult * sublane_mult)

    tile = min(tile_n, tile_from_vmem)
    # Keep the grid at >= 2 steps whenever N allows (v7x: 2 TensorCores share
    # the "parallel" axis; a length-1 grid forfeits one core).
    tile = min(tile, max(sublane_mult, _round_up(_cdiv(N, 2), sublane_mult)))
    tile = max(tile, sublane_mult)
    grid = (_cdiv(N, tile),)

    # ---- explicit VMEM limit from the actual footprint (no hard 48 MiB cap) ----
    needed = resident + tile * per_row
    vmem_limit = int(min(max(2 * needed, 32 * 2**20), (vmem_cap * 9) // 10))
    vmem_limit = min(max(vmem_limit, needed + (2 << 20)), vmem_cap)

    out = pl.pallas_call(
        spectral_adapter_kernel,
        out_shape=jax.ShapeDtypeStruct((N, D), out_dtype),
        grid_spec=pltpu.PrefetchScalarGridSpec(
            num_scalar_prefetch=0,
            grid=grid,
            in_specs=[
                pl.BlockSpec((tile, D), lambda i: (i, 0)),   # x row tile
                _resident_spec((D, D)),                      # W   (resident, 1-buffered)
                _resident_spec((1, D)),                      # bias (resident, 1-buffered)
            ],
            out_specs=pl.BlockSpec((tile, D), lambda i: (i, 0)),
        ),
        compiler_params=pltpu.CompilerParams(
            dimension_semantics=("parallel",),
            vmem_limit_bytes=vmem_limit,
        ),
    )(x, w, bias)
    return out


def spectral_adapter_ref(x, mean, basis, lambdas):
    # Pure-JAX reference mirroring the PyTorch forward exactly (two einsums).
    inverse_basis = basis.T
    xc = x - mean
    y = jnp.einsum('nd,dk->nk', xc, basis * lambdas[:, None])
    return jnp.einsum('nk,kd->nd', y, inverse_basis)


if __name__ == "__main__":
    N, D = 512, 128  # lane-aligned feature dim; small demo shapes

    key = jax.random.PRNGKey(0)
    kx, kmean, kbasis, klam = jax.random.split(key, 4)

    x = jax.random.normal(kx, (N, D), dtype=jnp.float32)
    mean = jax.random.normal(kmean, (D,), dtype=jnp.float32)
    # Deterministic synthetic square basis (module init takes it as given).
    basis = jax.random.normal(kbasis, (D, D), dtype=jnp.float32) / jnp.sqrt(D)
    # lambda_init == 'randn' path: randn + 1 (deterministic via PRNG key).
    lambdas = jax.random.normal(klam, (D,), dtype=jnp.float32) + 1.0

    out = spectral_adapter_forward(x, mean, basis, lambdas)
    out = jax.block_until_ready(out)

    ref = spectral_adapter_ref(x, mean, basis, lambdas)
    assert out.shape == (N, D)
    # Fused W = (basis*lambdas)@basis.T changes f32 rounding order vs the
    # two-einsum reference -> slightly looser (still tight) tolerance.
    assert jnp.allclose(out, ref, atol=2e-3, rtol=2e-3), "mismatch vs reference"

    print("KERNEL_OK")
</pallas_src>

<mosaic_0001>
module attributes {stable_mosaic.version = 11 : i64} {
  func.func @spectral_adapter_kernel(%arg0: i32, %arg1: memref<256x128xf32, #tpu.memory_space<vmem>>, %arg2: memref<128x128xf32, #tpu.memory_space<vmem>>, %arg3: memref<1x128xf32, #tpu.memory_space<vmem>>, %arg4: memref<256x128xf32, #tpu.memory_space<vmem>>) attributes {dimension_semantics = [#tpu.dimension_semantics<parallel>], iteration_bounds = array<i64: 2>, scalar_prefetch = 0 : i64, scratch_operands = 0 : i64, tpu.core_type = #tpu.core_type<tc>, window_params = [{transform_indices = @transform_0, window_bounds = array<i64: 256, 128>}, {pipeline_mode = #tpu.pipeline_mode<synchronous>, transform_indices = @transform_1, window_bounds = array<i64: 128, 128>}, {pipeline_mode = #tpu.pipeline_mode<synchronous>, transform_indices = @transform_2, window_bounds = array<i64: 1, 128>}, {transform_indices = @transform_3, window_bounds = array<i64: 256, 128>}]} {
    %c0 = arith.constant 0 : index
    %c0_0 = arith.constant 0 : index
    %0 = vector.load %arg1[%c0, %c0_0] : memref<256x128xf32, #tpu.memory_space<vmem>>, vector<256x128xf32>
    %c0_1 = arith.constant 0 : index
    %c0_2 = arith.constant 0 : index
    %1 = vector.load %arg2[%c0_1, %c0_2] : memref<128x128xf32, #tpu.memory_space<vmem>>, vector<128x128xf32>
    %cst = arith.constant dense<0.000000e+00> : vector<256x128xf32>
    %2 = tpu.matmul %0, %1, %cst {dimension_numbers = #tpu.dot_dimension_numbers<[1], [0], [0], [1], [0, 0, 1, 1], [], []>} : vector<256x128xf32>, vector<128x128xf32>, vector<256x128xf32> -> vector<256x128xf32>
    %c0_3 = arith.constant 0 : index
    %c0_4 = arith.constant 0 : index
    %3 = vector.load %arg3[%c0_3, %c0_4] : memref<1x128xf32, #tpu.memory_space<vmem>>, vector<1x128xf32>
    %4 = vector.broadcast %3 : vector<1x128xf32> to vector<256x128xf32>
    %5 = arith.subf %2, %4 : vector<256x128xf32>
    %c0_5 = arith.constant 0 : index
    %c0_6 = arith.constant 0 : index
    %6 = vector.load %arg4[%c0_5, %c0_6] : memref<256x128xf32, #tpu.memory_space<vmem>>, vector<256x128xf32>
    tpu.vector_store %arg4[%c0_5, %c0_6], %5 {strides = array<i32>} : memref<256x128xf32, #tpu.memory_space<vmem>>, vector<256x128xf32>,
    return
  }
  func.func @transform_0(%arg0: i32) -> (i32, i32) {
    %c0_i32 = arith.constant 0 : i32
    %c0_i32_0 = arith.constant 0 : i32
    return %arg0, %c0_i32 : i32, i32
  }
  func.func @transform_1(%arg0: i32) -> (i32, i32) {
    %c0_i32 = arith.constant 0 : i32
    %c0_i32_0 = arith.constant 0 : i32
    %c0_i32_1 = arith.constant 0 : i32
    return %c0_i32, %c0_i32_0 : i32, i32
  }
  func.func @transform_2(%arg0: i32) -> (i32, i32) {
    %c0_i32 = arith.constant 0 : i32
    %c0_i32_0 = arith.constant 0 : i32
    %c0_i32_1 = arith.constant 0 : i32
    return %c0_i32, %c0_i32_0 : i32, i32
  }
  func.func @transform_3(%arg0: i32) -> (i32, i32) {
    %c0_i32 = arith.constant 0 : i32
    %c0_i32_0 = arith.constant 0 : i32
    return %arg0, %c0_i32 : i32, i32
  }
}

</mosaic_0001>

<bundles_post_ra>
// kernel: tpu_custom_call.1
= control target key start
LH: loop header
LB: loop body
LE: loop exit
PB: predicated region body
PF: predicated region fallthrough
CT: control target
= control target key end

     0   :  { %8 = vsyncpa [#allocation3], 0  ;;  %s1331_s0 = inlined_call_operand.hbm [shape: f32[512,128], index: 0, kind: input, shape index: {}]   ;;  %s1332_s1 = inlined_call_operand.hbm [shape: f32[128,128], index: 1, kind: input, shape index: {}]   ;;  %s1333_s2 = inlined_call_operand.vmem [shape: f32[1,128], index: 2, kind: input, shape index: {}]   ;;  %s1334_s3 = inlined_call_operand.hbm [shape: f32[512,128], index: 3, kind: output, shape index: {}]  }
   0x1   :  { %10 = vsyncpa [#allocation3 + $0x1], 0 }
   0x2   :  { %11 = vsyncpa [#allocation6], 0 }
   0x3   :  { %12 = vsyncpa [#allocation4], 0 }
   0x4   :  { %14 = vsyncpa [#allocation4 + $0x1], 0  ;;  %s1038_s12 = smov 0   ;;  %s1040_s13 = smov 0  }
   0x5   :  { %s1042_s14 = smov 0   ;;  %s1044_s15 = smov 0  }
   0x6 LB: > { %s1059_s16 = sadd.s32 4294967295, %s1009_s15   ;;  %s647_s17 = sadd.s32 4294967294, %s1009_s15   ;;  %s1009_s15 = sphi %s1044_s15, %s1356_s15   ;;  %s1005_s14 = sphi %s1042_s14, %s1355_s14   ;;  %s1001_s13 = sphi %s1040_s13, %s1354_s13   ;;  %s997_s12 = sphi %s1038_s12, %s1353_s12  }
   0x7   : > { %p40_p0 = scmp.ne.s32.totalorder %s1001_s13, %s997_s12  ;;  %p1335_p1 = scmp.eq.s32.totalorder %s1059_s16, 0 }
   0x8   : > { %p112_p3 = scmp.eq.s32.totalorder %s647_s17, 1  ;;  %p648_p5 = scmp.ge.s32.totalorder %s1009_s15, 1 }
   0x9   : > { %p1068_p4 = por %p1335_p1, %p40_p0  ;;  %p119_p7 = scmp.lt.s32.totalorder %s1009_s15, 3 }
   0xa   : > { %p1073_p6 = por %p112_p3, %p40_p0  ;;  %s1011_s21 = smov [#allocation5]  }
   0xb   : > { %s1339_s18 = scalar_select %p1068_p4, 1, 0 }
   0xc   : > { %s1340_s19 = scalar_select %p1073_p6, 1, 0 }
   0xd   : > { %p1078_p8 = pnand %p648_p5, %p119_p7  ;;  %s131_s22 = sshll.u32 %s1011_s21, 4  ;;  %s132_s22 = int_to_ptr.vmem [resolvable:$true] %s131_s22 }
   0xe   : > { %s1092_s24 = sadd.s32 1, %s1009_s15   ;;  %s27_s25 = sadd.s32 1, %s1005_s14 }
   0xf   : > { %s1341_s20 = scalar_select %p1078_p8, 1, 0 }
  0x10   : > { %p834_p9 = pneg %p1078_p8  ;;  %s24_s26 = ssub.s32 %s1009_s15, %s1092_s24 }
  0x11   : > { %s898_s27 = scalar_lea.vmem %s132_s22, 2048  ;;  %p906_p5 = scmp.lt.s32.totalorder %s132_s22, %s132_s22 }
  0x12   : > { %p1087_p11 = pnand %p834_p9, %p1335_p1  ;;  %p899_p13 = scmp.ne.s32.totalorder %s132_s22, %s898_s27 }
  0x13   : > { %p907_p7 = scmp.lt.s32.totalorder %s898_s27, %s898_s27 }
  0x14   : > { %p889_p12 = pneg %p1087_p11 }
  0x15   : > { %p908_p10 = por %p907_p7, %p906_p5 }
  0x16   : > { %p901_p0 = pnand %p899_p13, %p889_p12 }
  0x18   : > { %p902_p3 = pneg %p901_p0 }
  0x1a   : > { %p909_p2 = pnand %p908_p10, %p902_p3 }
  0x1c   : > { %912 = shalt.err (!%p909_p2)
}
  0x1d   : > { %s1012_s28 = smov 128   ;;  %s1013_s29 = smov 8  }
  0x1e   : > { %837 = dma.hbm_to_vmem [thread:$0]  (!%p1087_p11), %s1332_s1, 2048, %s132_s22, [#allocation6], %s1012_s28, %s1012_s28, %s1013_s29  }
  0x1f   : > { %p25_p2 = scmp.eq.s32.totalorder %s24_s26, 0  ;;  %p34_p9 = scmp.ne.s32.totalorder %s1005_s14, %s1001_s13 }
  0x20   : > { %p35_p10 = scmp.eq.s32.totalorder %s1009_s15, 0  ;;  %p847_p12 = scmp.lt.s32.totalorder %s1009_s15, 2 }
  0x21   : > { %s1112_s5 = scalar_select %p25_p2, %s1005_s14, %s27_s25  }
  0x22   : > { %p36_p13 = por %p35_p10, %p34_p9  ;;  %p1343_p0 = scmp.eq.s32.totalorder %s1059_s16, 1 }
  0x23   : > { %s148_s7 = sand.u32 1, %s1005_s14   ;;  %s664_s8 = sshll.u32 %s1009_s15, 12 }
  0x24   : > { %p1116_p3 = por %p1343_p0, %p34_p9  ;;  %s651_s9 = sshll.u32 %s148_s7, 8 }
  0x25   : > { %s1125_s17 = scalar_lea.hbm %s1331_s0, %s664_s8  ;;  %s152_s21 = scalar_lea.vmem [#allocation2], %s651_s9 }
  0x26   : > { %s1344_s6 = scalar_select %p1116_p3, 1, 0 }
  0x27   : > { %s159_s22 = sshll.u32 %s152_s21, 4  ;;  %p1127_p11 = pnand %p847_p12, %p36_p13  ;;  %s1131_s22 = int_to_ptr.vmem [resolvable:$true] %s159_s22 }
  0x28   : > { %s1133_s25 = scalar_lea.sflag [#allocation3], %s148_s7  ;;  %s913_s26 = scalar_lea.hbm %s1125_s17, 4096 }
  0x29   : > { %p914_p5 = scmp.ne.s32.totalorder %s1125_s17, %s913_s26  ;;  %p915_p7 = pneg %p1127_p11 }
  0x2a   : > { %s918_s4 = scalar_lea.hbm %s1331_s0, 8192  ;;  %p919_p10 = scmp.lt.s32.totalorder %s1125_s17, %s1331_s0 }
  0x2b   : > { %p916_p2 = pnand %p915_p7, %p914_p5  ;;  %p920_p12 = scmp.lt.s32.totalorder %s918_s4, %s913_s26 }
  0x2d   : > { %p917_p9 = pneg %p916_p2  ;;  %p921_p13 = por %p920_p12, %p919_p10 }
  0x2f   : > { %p922_p0 = pnand %p921_p13, %p917_p9 }
  0x31   : > { %925 = shalt.err (!%p922_p0)
}
  0x32   : > { %s926_s7 = scalar_lea.vmem %s1131_s22, 4096  ;;  %s1014_s10 = smov [#allocation2]  }
  0x33   : > { %p927_p1 = scmp.ne.s32.totalorder %s1131_s22, %s926_s7  ;;  %s931_s11 = sshll.u32 %s1014_s10, 4  ;;  %s932_s11 = int_to_ptr.vmem [resolvable:$false] %s931_s11 }
  0x34   : > { %s933_s21 = scalar_lea.vmem %s932_s11, 8192  ;;  %p934_p2 = scmp.lt.s32.totalorder %s1131_s22, %s932_s11 }
  0x35   : > { %p929_p6 = pnand %p927_p1, %p915_p7  ;;  %p935_p3 = scmp.lt.s32.totalorder %s933_s21, %s926_s7 }
  0x37   : > { %p930_p5 = pneg %p929_p6  ;;  %p936_p4 = por %p935_p3, %p934_p2 }
  0x39   : > { %p937_p8 = pnand %p936_p4, %p930_p5 }
  0x3b   : > { %940 = shalt.err (!%p937_p8)
}
  0x3c   : > { %841 = dma.hbm_to_vmem [thread:$0]  (!%p1127_p11), %s1125_s17, 4096, %s1131_s22, %s1133_s25, %s1012_s28, %s1012_s28, %s1013_s29  }
  0x3d   : > { %p1346_p1 = scmp.ne.s32.totalorder %s1341_s20, 0 }
  0x3e   : > { %s1160_s26 = sand.u32 (!%p1346_p1), 1, %s1001_s13   ;;  %p1347_p4 = scmp.ne.s32.totalorder (!%p1346_p1), %s1339_s18, 0 }
  0x3f   : > { %171 = sbr.rel (%p1346_p1) target bundleno = 345 (0x159), region = 32  ;;  %s655_s27 = sshll.u32 (!%p1346_p1), %s1160_s26, 8 }
  0x40   : > { %s174_s30 = scalar_lea.sflag (!%p1346_p1), [#allocation3], %s1160_s26  ;;  %s1166_s23 = scalar_lea.vmem (!%p1346_p1), [#allocation2], %s655_s27 }
  0x44   : > { %984 = dma.done.wait (%p1347_p4), %s174_s30, 4096  }
  0x45   : > { %986 = vsyncadd (%p1347_p4), %s174_s30, 4294963200  ;;  %p1348_p6 = scmp.eq.s32.totalorder %s1059_s16, 0 }
  0x47   : > { %988 = dma.done.wait (%p1348_p6), [#allocation6], 2048   ;;  %p1349_p8 = pmov %p1348_p6 }
  0x48   : > { %v253_v0 = vld [vmem:[#allocation5 + $0x78] sm:$0xff]  ;;  %v252_v1 = vld [vmem:[#allocation5 + $0x70] sm:$0xff]  ;;  %v251_v2 = vld [vmem:[#allocation5 + $0x68] sm:$0xff]  ;;  %s1217_s28 = scalar_lea.vmem [#allocation7], %s655_s27  ;;  %s665_s29 = sshll.u32 %s1059_s16, 12 }
  0x49   : > { %990 = vsyncadd (%p1349_p8), [#allocation6], 4294965248  ;;  %714 = vmatprep.subr.mxu0 %v253_v0  ;;  %794 = vmatprep.subr.mxu1 %v253_v0  ;;  %v250_v3 = vld [vmem:[#allocation5 + $0x60] sm:$0xff]  ;;  %v249_v4 = vld [vmem:[#allocation5 + $0x58] sm:$0xff]  ;;  %s564_s17 = sshll.u32 %s1217_s28, 4  ;;  %s1280_s4 = scalar_lea.hbm %s1334_s3, %s665_s29  ;;  %s1282_s17 = int_to_ptr.vmem [resolvable:$true] %s564_s17 }
  0x4a   : > { %715 = vmatpush3.msra.mxu0 %v253_v0  ;;  %810 = vmatpush3.msra.mxu1 %v253_v0  ;;  %v248_v5 = vld [vmem:[#allocation5 + $0x50] sm:$0xff]  ;;  %v247_v6 = vld [vmem:[#allocation5 + $0x48] sm:$0xff]  ;;  %v246_v7 = vld [vmem:[#allocation5 + $0x40] sm:$0xff]  ;;  %s551_s16 = scalar_lea.sflag [#allocation4], %s1160_s26  ;;  %s941_s8 = scalar_lea.vmem %s1282_s17, 4096 }
  0x4b   : > { %716 = vmatprep.subr.mxu0 %v252_v1  ;;  %795 = vmatprep.subr.mxu1 %v252_v1  ;;  %v245_v8 = vld [vmem:[#allocation5 + $0x38] sm:$0xff]  ;;  %v244_v9 = vld [vmem:[#allocation5 + $0x30] sm:$0xff]  ;;  %v243_v10 = vld [vmem:[#allocation5 + $0x28] sm:$0xff]  ;;  %p942_p3 = scmp.ne.s32.totalorder %s1282_s17, %s941_s8  ;;  %p1350_p11 = scmp.ne.s32.totalorder %s1344_s6, 0 }
  0x4c   : > { %717 = vmatpush3.msra.mxu0 %v252_v1  ;;  %811 = vmatpush3.msra.mxu1 %v252_v1  ;;  %v242_v11 = vld [vmem:[#allocation5 + $0x20] sm:$0xff]  ;;  %v241_v12 = vld [vmem:[#allocation5 + $0x18] sm:$0xff]  ;;  %v240_v13 = vld [vmem:[#allocation5 + $0x10] sm:$0xff]  ;;  %s1015_s9 = smov [#allocation7]  }
  0x4d   : > { %718 = vmatprep.subr.mxu0 %v251_v2  ;;  %796 = vmatprep.subr.mxu1 %v251_v2  ;;  %v239_v14 = vld [vmem:[#allocation5 + $0x8] sm:$0xff]  ;;  %v238_v15 = vld [vmem:[#allocation5] sm:$0xff]  ;;  %v208_v20 = vld [vmem:[%s1166_s23 + $0x10] sm:$0xff]  ;;  %p943_p7 = pnand %p942_p3, %p1350_p11  ;;  %s945_s7 = sshll.u32 %s1015_s9, 4  ;;  %s946_s7 = int_to_ptr.vmem [resolvable:$false] %s945_s7 }
  0x4e   : > { %719 = vmatpush3.msra.mxu0 %v251_v2  ;;  %812 = vmatpush3.msra.mxu1 %v251_v2  ;;  %v206_v16 = vld [vmem:[%s1166_s23] sm:$0xff]  ;;  %v207_v18 = vld [vmem:[%s1166_s23 + $0x8] sm:$0xff]  ;;  %v224_v21 = vld [vmem:[%s1166_s23 + $0x90] sm:$0xff]  ;;  %s947_s10 = scalar_lea.vmem %s946_s7, 8192  ;;  %p948_p10 = scmp.lt.s32.totalorder %s1282_s17, %s946_s7 }
  0x4f   : > { %720 = vmatprep.subr.mxu0 %v250_v3  ;;  %797 = vmatprep.subr.mxu1 %v250_v3  ;;  %v222_v17 = vld [vmem:[%s1166_s23 + $0x80] sm:$0xff]  ;;  %v223_v19 = vld [vmem:[%s1166_s23 + $0x88] sm:$0xff]  ;;  %v209_v22 = vld [vmem:[%s1166_s23 + $0x18] sm:$0xff]  ;;  %p944_p9 = pneg %p943_p7  ;;  %p949_p12 = scmp.lt.s32.totalorder %s947_s10, %s941_s8 }
  0x50   : > { %721 = vmatpush3.msra.mxu0 %v250_v3  ;;  %813 = vmatpush3.msra.mxu1 %v250_v3  ;;  %v225_v23 = vld [vmem:[%s1166_s23 + $0x98] sm:$0xff]  ;;  %v210_v24 = vld [vmem:[%s1166_s23 + $0x20] sm:$0xff]  ;;  %v211_v26 = vld [vmem:[%s1166_s23 + $0x28] sm:$0xff] }
  0x51   : > { %722 = vmatprep.subr.mxu0 %v249_v4  ;;  %798 = vmatprep.subr.mxu1 %v249_v4  ;;  %v226_v25 = vld [vmem:[%s1166_s23 + $0xa0] sm:$0xff]  ;;  %v227_v27 = vld [vmem:[%s1166_s23 + $0xa8] sm:$0xff]  ;;  %v212_v28 = vld [vmem:[%s1166_s23 + $0x30] sm:$0xff]  ;;  %p950_p13 = por %p949_p12, %p948_p10 }
  0x52   : > { %723 = vmatpush3.msra.mxu0 %v249_v4  ;;  %814 = vmatpush3.msra.mxu1 %v249_v4  ;;  %v228_v29 = vld [vmem:[%s1166_s23 + $0xb0] sm:$0xff]  ;;  %v213_v30 = vld [vmem:[%s1166_s23 + $0x38] sm:$0xff]  ;;  %v214_v32 = vld [vmem:[%s1166_s23 + $0x40] sm:$0xff] }
  0x53   : > { %724 = vmatprep.subr.mxu0 %v248_v5  ;;  %799 = vmatprep.subr.mxu1 %v248_v5  ;;  %v229_v31 = vld [vmem:[%s1166_s23 + $0xb8] sm:$0xff]  ;;  %v230_v33 = vld [vmem:[%s1166_s23 + $0xc0] sm:$0xff]  ;;  %v215_v34 = vld [vmem:[%s1166_s23 + $0x48] sm:$0xff]  ;;  %p951_p0 = pnand %p950_p13, %p944_p9 }
  0x54   : > { %725 = vmatpush3.msra.mxu0 %v248_v5  ;;  %815 = vmatpush3.msra.mxu1 %v248_v5  ;;  %v231_v35 = vld [vmem:[%s1166_s23 + $0xc8] sm:$0xff]  ;;  %v216_v36 = vld [vmem:[%s1166_s23 + $0x50] sm:$0xff]  ;;  %v217_v38 = vld [vmem:[%s1166_s23 + $0x58] sm:$0xff] }
  0x55   : > { %726 = vmatprep.subr.mxu0 %v247_v6  ;;  %800 = vmatprep.subr.mxu1 %v247_v6  ;;  %v232_v37 = vld [vmem:[%s1166_s23 + $0xd0] sm:$0xff]  ;;  %v233_v39 = vld [vmem:[%s1166_s23 + $0xd8] sm:$0xff]  ;;  %v218_v40 = vld [vmem:[%s1166_s23 + $0x60] sm:$0xff] }
  0x56   : > { %727 = vmatpush3.msra.mxu0 %v247_v6  ;;  %816 = vmatpush3.msra.mxu1 %v247_v6  ;;  %v234_v41 = vld [vmem:[%s1166_s23 + $0xe0] sm:$0xff]  ;;  %v219_v42 = vld [vmem:[%s1166_s23 + $0x68] sm:$0xff]  ;;  %v220_v44 = vld [vmem:[%s1166_s23 + $0x70] sm:$0xff] }
  0x57   : > { %728 = vmatprep.subr.mxu0 %v246_v7  ;;  %801 = vmatprep.subr.mxu1 %v246_v7  ;;  %v235_v43 = vld [vmem:[%s1166_s23 + $0xe8] sm:$0xff]  ;;  %v236_v45 = vld [vmem:[%s1166_s23 + $0xf0] sm:$0xff]  ;;  %v221_v46 = vld [vmem:[%s1166_s23 + $0x78] sm:$0xff] }
  0x58   : > { %729 = vmatpush3.msra.mxu0 %v246_v7  ;;  %817 = vmatpush3.msra.mxu1 %v246_v7  ;;  %v237_v47 = vld [vmem:[%s1166_s23 + $0xf8] sm:$0xff]  ;;  %v1211_v48 = vld [vmem:[%s1333_s2] ss:$0 sm:$0xff] }
  0x59   : > { %730 = vmatprep.subr.mxu0 %v245_v8  ;;  %802 = vmatprep.subr.mxu1 %v245_v8 }
  0x5a   : > { %731 = vmatpush3.msra.mxu0 %v245_v8  ;;  %818 = vmatpush3.msra.mxu1 %v245_v8 }
  0x5b   : > { %732 = vmatprep.subr.mxu0 %v244_v9  ;;  %803 = vmatprep.subr.mxu1 %v244_v9 }
  0x5c   : > { %733 = vmatpush3.msra.mxu0 %v244_v9  ;;  %819 = vmatpush3.msra.mxu1 %v244_v9 }
  0x5d   : > { %734 = vmatprep.subr.mxu0 %v243_v10  ;;  %804 = vmatprep.subr.mxu1 %v243_v10 }
  0x5e   : > { %735 = vmatpush3.msra.mxu0 %v243_v10  ;;  %820 = vmatpush3.msra.mxu1 %v243_v10 }
  0x5f   : > { %736 = vmatprep.subr.mxu0 %v242_v11  ;;  %805 = vmatprep.subr.mxu1 %v242_v11 }
  0x60   : > { %737 = vmatpush3.msra.mxu0 %v242_v11  ;;  %821 = vmatpush3.msra.mxu1 %v242_v11 }
  0x61   : > { %738 = vmatprep.subr.mxu0 %v241_v12  ;;  %806 = vmatprep.subr.mxu1 %v241_v12 }
  0x62   : > { %739 = vmatpush3.msra.mxu0 %v241_v12  ;;  %822 = vmatpush3.msra.mxu1 %v241_v12 }
  0x63   : > { %740 = vmatprep.subr.mxu0 %v240_v13  ;;  %807 = vmatprep.subr.mxu1 %v240_v13 }
  0x64   : > { %741 = vmatpush3.msra.mxu0 %v240_v13  ;;  %823 = vmatpush3.msra.mxu1 %v240_v13 }
  0x65   : > { %742 = vmatprep.subr.mxu0 %v239_v14  ;;  %808 = vmatprep.subr.mxu1 %v239_v14 }
  0x66   : > { %743 = vmatpush3.msra.mxu0 %v239_v14  ;;  %824 = vmatpush3.msra.mxu1 %v239_v14 }
  0x67   : > { %744 = vmatprep.subr.mxu0 %v238_v15  ;;  %809 = vmatprep.subr.mxu1 %v238_v15 }
  0x68   : > { %745 = vmatpush3.msra.mxu0 %v238_v15  ;;  %825 = vmatpush3.msra.mxu1 %v238_v15 }
  0x69   : > { %746 = vmatprep.mubr.f32.mxu0 %v206_v16  ;;  %770 = vmatprep.mubr.f32.mxu1 %v222_v17 }
  0x6a   : > { %747 = vmatmul.mubr.f32.vlgmr.msra.gmra.mxu0 %v207_v18  ;;  %771 = vmatmul.mubr.f32.vlgmr.msra.gmra.mxu1 %v223_v19 }
  0x6b   : > { %749 = vmatprep.mubr.f32.mxu0 %v208_v20  ;;  %773 = vmatprep.mubr.f32.mxu1 %v224_v21 }
  0x6e   : > { %750 = vmatmul.mubr.f32.gmra.mxu0 %v209_v22  ;;  %774 = vmatmul.mubr.f32.gmra.mxu1 %v225_v23 }
  0x6f   : > { %752 = vmatprep.mubr.f32.mxu0 %v210_v24  ;;  %776 = vmatprep.mubr.f32.mxu1 %v226_v25 }
  0x72   : > { %753 = vmatmul.mubr.f32.gmra.mxu0 %v211_v26  ;;  %777 = vmatmul.mubr.f32.gmra.mxu1 %v227_v27 }
  0x73   : > { %755 = vmatprep.mubr.f32.mxu0 %v212_v28  ;;  %779 = vmatprep.mubr.f32.mxu1 %v228_v29 }
  0x76   : > { %756 = vmatmul.mubr.f32.gmra.mxu0 %v213_v30  ;;  %780 = vmatmul.mubr.f32.gmra.mxu1 %v229_v31 }
  0x77   : > { %758 = vmatprep.mubr.f32.mxu0 %v214_v32  ;;  %782 = vmatprep.mubr.f32.mxu1 %v230_v33 }
  0x7a   : > { %759 = vmatmul.mubr.f32.gmra.mxu0 %v215_v34  ;;  %783 = vmatmul.mubr.f32.gmra.mxu1 %v231_v35 }
  0x7b   : > { %761 = vmatprep.mubr.f32.mxu0 %v216_v36  ;;  %785 = vmatprep.mubr.f32.mxu1 %v232_v37 }
  0x7e   : > { %762 = vmatmul.mubr.f32.gmra.mxu0 %v217_v38  ;;  %786 = vmatmul.mubr.f32.gmra.mxu1 %v233_v39 }
  0x7f   : > { %764 = vmatprep.mubr.f32.mxu0 %v218_v40  ;;  %788 = vmatprep.mubr.f32.mxu1 %v234_v41 }
  0x82   : > { %765 = vmatmul.mubr.f32.gmra.mxu0 %v219_v42  ;;  %789 = vmatmul.mubr.f32.gmra.mxu1 %v235_v43 }
  0x83   : > { %767 = vmatprep.mubr.f32.mxu0 %v220_v44  ;;  %791 = vmatprep.mubr.f32.mxu1 %v236_v45 }
  0x86   : > { %768 = vmatmul.mubr.f32.gmra.mxu0 %v221_v46  ;;  %792 = vmatmul.mubr.f32.gmra.mxu1 %v237_v47 }
 0x12a   : > { %v748_v49 = vpop.f32.mrf.mxu0  ;;  %v772_v50 = vpop.f32.mrf.mxu1 }
 0x12b   : > { %v487_v51 = vsub.f32 %v748_v49, %v1211_v48  ;;  %v503_v52 = vsub.f32 %v772_v50, %v1211_v48 }
 0x12c   : > { %v320_v53 = vpop.f32.mrf.mxu0  ;;  %v400_v54 = vpop.f32.mrf.mxu1 }
 0x12d   : > { %519 = vst [vmem:[%s1217_s28 + $0x8] sm:$0xff] %v487_v51  ;;  %535 = vst [vmem:[%s1217_s28 + $0x88] sm:$0xff] %v503_v52  ;;  %v486_v55 = vsub.f32 %v320_v53, %v1211_v48  ;;  %v502_v56 = vsub.f32 %v400_v54, %v1211_v48 }
 0x12e   : > { %v751_v57 = vpop.f32.mrf.mxu0  ;;  %v775_v58 = vpop.f32.mrf.mxu1 }
 0x12f   : > { %518 = vst [vmem:[%s1217_s28] sm:$0xff] %v486_v55  ;;  %534 = vst [vmem:[%s1217_s28 + $0x80] sm:$0xff] %v502_v56  ;;  %v489_v59 = vsub.f32 %v751_v57, %v1211_v48  ;;  %v505_v60 = vsub.f32 %v775_v58, %v1211_v48 }
 0x130   : > { %v330_v61 = vpop.f32.mrf.mxu0  ;;  %v410_v62 = vpop.f32.mrf.mxu1 }
 0x131   : > { %521 = vst [vmem:[%s1217_s28 + $0x18] sm:$0xff] %v489_v59  ;;  %537 = vst [vmem:[%s1217_s28 + $0x98] sm:$0xff] %v505_v60  ;;  %v488_v63 = vsub.f32 %v330_v61, %v1211_v48  ;;  %v504_v0 = vsub.f32 %v410_v62, %v1211_v48 }
 0x132   : > { %v754_v1 = vpop.f32.mrf.mxu0  ;;  %v778_v2 = vpop.f32.mrf.mxu1 }
 0x133   : > { %520 = vst [vmem:[%s1217_s28 + $0x10] sm:$0xff] %v488_v63  ;;  %536 = vst [vmem:[%s1217_s28 + $0x90] sm:$0xff] %v504_v0  ;;  %v491_v3 = vsub.f32 %v754_v1, %v1211_v48  ;;  %v507_v4 = vsub.f32 %v778_v2, %v1211_v48 }
 0x134   : > { %v340_v5 = vpop.f32.mrf.mxu0  ;;  %v420_v6 = vpop.f32.mrf.mxu1 }
 0x135   : > { %523 = vst [vmem:[%s1217_s28 + $0x28] sm:$0xff] %v491_v3  ;;  %539 = vst [vmem:[%s1217_s28 + $0xa8] sm:$0xff] %v507_v4  ;;  %v490_v7 = vsub.f32 %v340_v5, %v1211_v48  ;;  %v506_v8 = vsub.f32 %v420_v6, %v1211_v48 }
 0x136   : > { %v757_v9 = vpop.f32.mrf.mxu0  ;;  %v781_v10 = vpop.f32.mrf.mxu1 }
 0x137   : > { %522 = vst [vmem:[%s1217_s28 + $0x20] sm:$0xff] %v490_v7  ;;  %538 = vst [vmem:[%s1217_s28 + $0xa0] sm:$0xff] %v506_v8  ;;  %v493_v11 = vsub.f32 %v757_v9, %v1211_v48  ;;  %v509_v12 = vsub.f32 %v781_v10, %v1211_v48 }
 0x138   : > { %v350_v13 = vpop.f32.mrf.mxu0  ;;  %v430_v14 = vpop.f32.mrf.mxu1 }
 0x139   : > { %525 = vst [vmem:[%s1217_s28 + $0x38] sm:$0xff] %v493_v11  ;;  %541 = vst [vmem:[%s1217_s28 + $0xb8] sm:$0xff] %v509_v12  ;;  %v492_v15 = vsub.f32 %v350_v13, %v1211_v48  ;;  %v508_v16 = vsub.f32 %v430_v14, %v1211_v48 }
 0x13a   : > { %v760_v17 = vpop.f32.mrf.mxu0  ;;  %v784_v18 = vpop.f32.mrf.mxu1 }
 0x13b   : > { %524 = vst [vmem:[%s1217_s28 + $0x30] sm:$0xff] %v492_v15  ;;  %540 = vst [vmem:[%s1217_s28 + $0xb0] sm:$0xff] %v508_v16  ;;  %v495_v19 = vsub.f32 %v760_v17, %v1211_v48  ;;  %v511_v20 = vsub.f32 %v784_v18, %v1211_v48 }
 0x13c   : > { %v360_v21 = vpop.f32.mrf.mxu0  ;;  %v440_v22 = vpop.f32.mrf.mxu1 }
 0x13d   : > { %527 = vst [vmem:[%s1217_s28 + $0x48] sm:$0xff] %v495_v19  ;;  %543 = vst [vmem:[%s1217_s28 + $0xc8] sm:$0xff] %v511_v20  ;;  %v494_v23 = vsub.f32 %v360_v21, %v1211_v48  ;;  %v510_v24 = vsub.f32 %v440_v22, %v1211_v48 }
 0x13e   : > { %v763_v25 = vpop.f32.mrf.mxu0  ;;  %v787_v26 = vpop.f32.mrf.mxu1 }
 0x13f   : > { %526 = vst [vmem:[%s1217_s28 + $0x40] sm:$0xff] %v494_v23  ;;  %542 = vst [vmem:[%s1217_s28 + $0xc0] sm:$0xff] %v510_v24  ;;  %v497_v27 = vsub.f32 %v763_v25, %v1211_v48  ;;  %v513_v28 = vsub.f32 %v787_v26, %v1211_v48 }
 0x140   : > { %v370_v29 = vpop.f32.mrf.mxu0  ;;  %v450_v30 = vpop.f32.mrf.mxu1 }
 0x141   : > { %529 = vst [vmem:[%s1217_s28 + $0x58] sm:$0xff] %v497_v27  ;;  %545 = vst [vmem:[%s1217_s28 + $0xd8] sm:$0xff] %v513_v28  ;;  %v496_v31 = vsub.f32 %v370_v29, %v1211_v48  ;;  %v512_v32 = vsub.f32 %v450_v30, %v1211_v48 }
 0x142   : > { %v766_v33 = vpop.f32.mrf.mxu0  ;;  %v790_v34 = vpop.f32.mrf.mxu1 }
 0x143   : > { %528 = vst [vmem:[%s1217_s28 + $0x50] sm:$0xff] %v496_v31  ;;  %544 = vst [vmem:[%s1217_s28 + $0xd0] sm:$0xff] %v512_v32  ;;  %v499_v35 = vsub.f32 %v766_v33, %v1211_v48  ;;  %v515_v36 = vsub.f32 %v790_v34, %v1211_v48 }
 0x144   : > { %v380_v37 = vpop.f32.mrf.mxu0  ;;  %v460_v38 = vpop.f32.mrf.mxu1 }
 0x145   : > { %531 = vst [vmem:[%s1217_s28 + $0x68] sm:$0xff] %v499_v35  ;;  %547 = vst [vmem:[%s1217_s28 + $0xe8] sm:$0xff] %v515_v36  ;;  %v498_v39 = vsub.f32 %v380_v37, %v1211_v48  ;;  %v514_v40 = vsub.f32 %v460_v38, %v1211_v48 }
 0x146   : > { %v769_v41 = vpop.f32.mrf.mxu0  ;;  %v793_v42 = vpop.f32.mrf.mxu1 }
 0x147   : > { %530 = vst [vmem:[%s1217_s28 + $0x60] sm:$0xff] %v498_v39  ;;  %546 = vst [vmem:[%s1217_s28 + $0xe0] sm:$0xff] %v514_v40  ;;  %v501_v43 = vsub.f32 %v769_v41, %v1211_v48  ;;  %v517_v44 = vsub.f32 %v793_v42, %v1211_v48 }
 0x148   : > { %v390_v45 = vpop.f32.mrf.mxu0  ;;  %v470_v46 = vpop.f32.mrf.mxu1 }
 0x149   : > { %533 = vst [vmem:[%s1217_s28 + $0x78] sm:$0xff] %v501_v43  ;;  %549 = vst [vmem:[%s1217_s28 + $0xf8] sm:$0xff] %v517_v44  ;;  %v500_v47 = vsub.f32 %v390_v45, %v1211_v48  ;;  %v516_v49 = vsub.f32 %v470_v46, %v1211_v48 }
 0x14b   : > { %532 = vst [vmem:[%s1217_s28 + $0x70] sm:$0xff] %v500_v47  ;;  %548 = vst [vmem:[%s1217_s28 + $0xf0] sm:$0xff] %v516_v49 }
 0x14c   : > { %954 = shalt.err (!%p951_p0)
}
 0x14d   : > { %s955_s11 = scalar_lea.hbm %s1280_s4, 4096  ;;  %s959_s30 = scalar_lea.hbm %s1334_s3, 8192 }
 0x14e   : > { %p956_p5 = scmp.ne.s32.totalorder %s1280_s4, %s955_s11  ;;  %p960_p4 = scmp.lt.s32.totalorder %s1280_s4, %s1334_s3 }
 0x14f   : > { %p961_p6 = scmp.lt.s32.totalorder %s959_s30, %s955_s11 }
 0x150   : > { %p957_p2 = pnand %p956_p5, %p1350_p11 }
 0x151   : > { %p962_p8 = por %p961_p6, %p960_p4 }
 0x152   : > { %p958_p1 = pneg %p957_p2 }
 0x154   : > { %p963_p3 = pnand %p962_p8, %p958_p1 }
 0x156   : > { %966 = shalt.err (!%p963_p3)
}
 0x157   : > { %s1016_s20 = smov 128   ;;  %s1017_s28 = smov 8  }
 0x158   : > { %832 = dma.vmem_to_hbm [thread:$0]  (%p1350_p11), %s1282_s17, 4096, %s1280_s4, %s551_s16, %s1016_s20, %s1016_s20, %s1017_s28  }
 0x159 PF: > { %s579_s29 = sand.u32 1, %s997_s12   ;;  %p1351_p7 = scmp.ne.s32.totalorder %s1340_s19, 0 }
 0x15a   : > { %p1352_p9 = scmp.ge.s32.totalorder %s1009_s15, 2  ;;  %s580_s22 = scalar_lea.sflag [#allocation4], %s579_s29 }
 0x15c   : > { %p843_p10 = pnand %p1352_p9, %p1351_p7 }
 0x15e   : > { %p844_p12 = pneg %p843_p10 }
 0x160   : > { %992 = dma.done.wait (%p844_p12), %s580_s22, 4096  }
 0x161   : > { %994 = vsyncadd (%p844_p12), %s580_s22, 4294963200  ;;  %p17_p13 = scmp.ge.s32.totalorder %s1092_s24, 4   ;;  %s1353_s12 = smov %s1001_s13 }
 0x162   : > { %s1354_s13 = smov %s1005_s14  ;;  %s1355_s14 = smov %s1112_s5 }
 0x163   : > { %s1356_s15 = smov %s1092_s24  ;;  %19 = sbr.rel (!%p17_p13) target bundleno = 6 (0x6), region = 81 }
 0x168   :  { %585 = vsyncpa [#allocation3], 1 }
 0x169   :  { %587 = vsyncpa [#allocation3 + $0x1], 1 }
 0x16a   :  { %588 = vsyncpa [#allocation6], 1 }
 0x16b   :  { %589 = vsyncpa [#allocation4], 1 }
 0x16c   :  { %591 = vsyncpa [#allocation4 + $0x1], 1 }

</bundles_post_ra>
